<compile_context>
chip_gen: v5e
topology: v5e:2x2
jax: 0.10.0
libtpu: 0.0.40
codegen_flags: <defaults>
</compile_context>

<pallas_src>
import functools
import math

import jax
import jax.numpy as jnp
from jax.experimental import pallas as pl
from jax.experimental.pallas import tpu as pltpu


def _sinusoidal_pe_kernel(pos_ref, inv_freq_ref, out_ref, *,
                          padding_idx, half, out_width):
    """One row tile of the flattened (B*S, embedding_dim) output.

    pos_ref:      (TILE, 1)          f32 positions (padding rows = padding_idx)
    inv_freq_ref: (1, half)          f32 frequency vector
    out_ref:      (TILE, out_width)  f32; [:, :half]=sin, [:, half:2h]=cos,
                                     trailing column (odd dim) = 0
    """
    pos = pos_ref[...]                                  # (TILE, 1)
    keep = pos != float(padding_idx)                    # (TILE, 1) bool
    freq = inv_freq_ref[...]                            # (1, half)
    zero = jnp.float32(0.0)
    # pos*freq recomputed per store on purpose: avoids a shared (TILE, half)
    # f32 live temp in VMEM; the extra VPU multiply hides under sin/cos (EUP)
    # and the HBM writeback.  For typical dims (half % 128 == 0) both slab
    # stores are lane-dense.
    out_ref[:, :half] = jnp.where(keep, jnp.sin(pos * freq), zero)
    out_ref[:, half:2 * half] = jnp.where(keep, jnp.cos(pos * freq), zero)
    if out_width != 2 * half:
        # Odd embedding_dim: PyTorch appends one zero column; written in-kernel
        # so the wrapper never re-copies the full output with jnp.pad.
        out_ref[:, 2 * half:] = jnp.zeros(
            (pos.shape[0], out_width - 2 * half), jnp.float32)


def _round_up(x, m):
    return ((x + m - 1) // m) * m


def _pick_row_tile(total_rows, out_width):
    """Pick the row tile: as big as a conservative VMEM budget allows (fewer,
    fatter grid steps), capped so there are >= 2 grid steps (v7x megacore)
    whenever enough rows exist."""
    try:
        # v7x has 64 MiB VMEM per TensorCore vs 128 MiB on v5e/v6e.
        vmem_bytes = int(getattr(pltpu.get_tpu_info(),
                                 "vmem_capacity_bytes", 128 * 1024 * 1024))
    except Exception:
        vmem_bytes = 128 * 1024 * 1024
    budget = min(24 * 1024 * 1024, vmem_bytes // 4)  # stays under scoped default

    # Per-row VMEM cost: double-buffered output tile (2 * width * 4 B) + the
    # (TILE, 1) positions block stored at 128-lane granularity (~512 B/row x2).
    per_row = 2 * out_width * 4 + 2 * 512
    tile = (budget // per_row) // 8 * 8
    tile = max(8, min(tile, 4096))
    if total_rows > 8:
        # Keep at least two grid steps so both v7x TensorCores get work.
        tile = min(tile, _round_up(pl.cdiv(total_rows, 2), 8))
    return int(tile)


def sinusoidal_positional_embedding(ids, embedding_dim, padding_idx):
    """ids: int array [bsz, seqlen]  ->  float32 [bsz, seqlen, embedding_dim]."""
    B, S = ids.shape
    D = int(embedding_dim)
    half = D // 2
    assert half >= 1, "embedding_dim must be >= 2"
    d_even = 2 * half

    # ---- make_positions (mask + cumsum): tiny [B,S] int32 work, plain JAX ----
    ids = ids.astype(jnp.int32)
    mask = (ids != padding_idx).astype(jnp.int32)
    pos = jnp.cumsum(mask, axis=1) * mask + padding_idx           # (B, S) int32
    total = B * S
    pos_flat = pos.reshape(total, 1).astype(jnp.float32)

    # ---- row tiling ----
    tile = _pick_row_tile(total, D)
    n_tiles = pl.cdiv(total, tile)
    padded_rows = n_tiles * tile
    if padded_rows != total:
        # Only the tiny (total, 1) positions input is padded (padding rows map
        # to the zero embedding).  The output keeps exactly `total` rows — the
        # partial last output block is masked by Pallas — so no slice/copy of
        # the full result is needed afterwards.
        pos_flat = jnp.pad(pos_flat, ((0, padded_rows - total), (0, 0)),
                           constant_values=float(padding_idx))

    # Frequency vector (matches get_embedding); guard half == 1 div-by-zero.
    scale = math.log(10000.0) / max(half - 1, 1)
    inv_freq = jnp.exp(jnp.arange(half, dtype=jnp.float32) * -scale)
    inv_freq = inv_freq.reshape(1, half)

    kernel = functools.partial(_sinusoidal_pe_kernel,
                               padding_idx=int(padding_idx),
                               half=half, out_width=D)

    cost = pl.CostEstimate(
        flops=total * (2 * half + d_even),          # angle muls + mask selects
        transcendentals=total * d_even,             # one sin/cos per element
        bytes_accessed=total * D * 4 + padded_rows * 4 + half * 4,
    )

    out = pl.pallas_call(
        kernel,
        out_shape=jax.ShapeDtypeStruct((total, D), jnp.float32),
        grid=(n_tiles,),
        in_specs=[
            pl.BlockSpec((tile, 1), lambda i: (i, 0)),     # positions tile
            pl.BlockSpec((1, half), lambda i: (0, 0)),     # freqs (stay resident)
        ],
        out_specs=pl.BlockSpec((tile, D), lambda i: (i, 0)),
        compiler_params=pltpu.CompilerParams(
            dimension_semantics=("parallel",)),            # megacore on v7x
        cost_estimate=cost,
    )(pos_flat, inv_freq)

    # Contiguous reshape only — no slice, no pad, no extra HBM copy.
    return out.reshape(B, S, D)


def _reference(ids, embedding_dim, padding_idx):
    """Pure-JAX mirror of the PyTorch forward (table build + gather)."""
    B, S = ids.shape
    num = padding_idx + 1 + S
    half = embedding_dim // 2
    scale = math.log(10000.0) / max(half - 1, 1)
    freq = jnp.exp(jnp.arange(half, dtype=jnp.float32) * -scale)
    ang = jnp.arange(num, dtype=jnp.float32)[:, None] * freq[None, :]
    table = jnp.concatenate([jnp.sin(ang), jnp.cos(ang)], axis=1)
    if embedding_dim % 2 == 1:
        table = jnp.pad(table, ((0, 0), (0, 1)))
    table = table.at[padding_idx].set(0.0)
    mask = (ids != padding_idx).astype(jnp.int32)
    pos = jnp.cumsum(mask, axis=1) * mask + padding_idx
    return table[pos.reshape(-1)].reshape(B, S, embedding_dim)


if __name__ == "__main__":
    B, S, D = 2, 8, 32
    padding_idx = 1

    key = jax.random.PRNGKey(0)
    ids = jax.random.randint(key, (B, S), 0, 10, dtype=jnp.int32)
    # Force some trailing padding tokens to exercise the padding path.
    ids = ids.at[0, 6:].set(padding_idx)
    ids = ids.at[1, 4:].set(padding_idx)

    out = sinusoidal_positional_embedding(ids, D, padding_idx)
    out = jax.block_until_ready(out)

    ref = _reference(ids, D, padding_idx)
    assert out.shape == (B, S, D) and out.dtype == jnp.float32
    assert jnp.allclose(out, ref, atol=1e-5), "mismatch vs reference"

    print("KERNEL_OK")
</pallas_src>

<mosaic_0001>
module attributes {stable_mosaic.version = 11 : i64} {
  func.func @_sinusoidal_pe_kernel(%arg0: i32, %arg1: memref<8x1xf32, #tpu.memory_space<vmem>>, %arg2: memref<1x16xf32, #tpu.memory_space<vmem>>, %arg3: memref<8x32xf32, #tpu.memory_space<vmem>>) attributes {dimension_semantics = [#tpu.dimension_semantics<parallel>], iteration_bounds = array<i64: 2>, scalar_prefetch = 0 : i64, scratch_operands = 0 : i64, tpu.core_type = #tpu.core_type<tc>, window_params = [{transform_indices = @transform_0, window_bounds = array<i64: 8, 1>}, {pipeline_mode = #tpu.pipeline_mode<synchronous>, transform_indices = @transform_1, window_bounds = array<i64: 1, 16>}, {transform_indices = @transform_2, window_bounds = array<i64: 8, 32>}]} {
    %c0 = arith.constant 0 : index
    %c0_0 = arith.constant 0 : index
    %0 = vector.load %arg1[%c0, %c0_0] : memref<8x1xf32, #tpu.memory_space<vmem>>, vector<8x1xf32>
    %cst = arith.constant 1.000000e+00 : f32
    %1 = vector.broadcast %cst : f32 to vector<8x1xf32>
    %2 = arith.cmpf one, %0, %1 : vector<8x1xf32>
    %c0_1 = arith.constant 0 : index
    %c0_2 = arith.constant 0 : index
    %3 = vector.load %arg2[%c0_1, %c0_2] : memref<1x16xf32, #tpu.memory_space<vmem>>, vector<1x16xf32>
    %4 = vector.broadcast %0 : vector<8x1xf32> to vector<8x16xf32>
    %5 = vector.broadcast %3 : vector<1x16xf32> to vector<8x16xf32>
    %6 = arith.mulf %4, %5 : vector<8x16xf32>
    %7 = math.sin %6 : vector<8x16xf32>
    %cst_3 = arith.constant 0.000000e+00 : f32
    %8 = vector.shape_cast %2 : vector<8x1xi1> to vector<8x1xi1>
    %9 = vector.broadcast %8 : vector<8x1xi1> to vector<8x16xi1>
    %10 = vector.broadcast %cst_3 : f32 to vector<8x16xf32>
    %11 = arith.select %9, %7, %10 : vector<8x16xi1>, vector<8x16xf32>
    %c0_4 = arith.constant 0 : index
    %c0_5 = arith.constant 0 : index
    %12 = vector.load %arg3[%c0_4, %c0_5] : memref<8x32xf32, #tpu.memory_space<vmem>>, vector<8x16xf32>
    tpu.vector_store %arg3[%c0_4, %c0_5], %11 {strides = array<i32>} : memref<8x32xf32, #tpu.memory_space<vmem>>, vector<8x16xf32>,
    %13 = vector.broadcast %0 : vector<8x1xf32> to vector<8x16xf32>
    %14 = vector.broadcast %3 : vector<1x16xf32> to vector<8x16xf32>
    %15 = arith.mulf %13, %14 : vector<8x16xf32>
    %16 = math.cos %15 : vector<8x16xf32>
    %cst_6 = arith.constant 0.000000e+00 : f32
    %17 = vector.shape_cast %2 : vector<8x1xi1> to vector<8x1xi1>
    %18 = vector.broadcast %17 : vector<8x1xi1> to vector<8x16xi1>
    %19 = vector.broadcast %cst_6 : f32 to vector<8x16xf32>
    %20 = arith.select %18, %16, %19 : vector<8x16xi1>, vector<8x16xf32>
    %c0_7 = arith.constant 0 : index
    %c16 = arith.constant 16 : index
    %21 = vector.load %arg3[%c0_7, %c16] : memref<8x32xf32, #tpu.memory_space<vmem>>, vector<8x16xf32>
    tpu.vector_store %arg3[%c0_7, %c16], %20 {strides = array<i32>} : memref<8x32xf32, #tpu.memory_space<vmem>>, vector<8x16xf32>,
    return
  }
  func.func @transform_0(%arg0: i32) -> (i32, i32) {
    %c0_i32 = arith.constant 0 : i32
    %c0_i32_0 = arith.constant 0 : i32
    return %arg0, %c0_i32 : i32, i32
  }
  func.func @transform_1(%arg0: i32) -> (i32, i32) {
    %c0_i32 = arith.constant 0 : i32
    %c0_i32_0 = arith.constant 0 : i32
    %c0_i32_1 = arith.constant 0 : i32
    return %c0_i32, %c0_i32_0 : i32, i32
  }
  func.func @transform_2(%arg0: i32) -> (i32, i32) {
    %c0_i32 = arith.constant 0 : i32
    %c0_i32_0 = arith.constant 0 : i32
    return %arg0, %c0_i32 : i32, i32
  }
}

</mosaic_0001>

<bundles_post_ra>
// kernel: tpu_custom_call.1
= control target key start
LH: loop header
LB: loop body
LE: loop exit
PB: predicated region body
PF: predicated region fallthrough
CT: control target
= control target key end

     0   :  { %7 = vsyncpa [#allocation3], 0  ;;  %s856_s0 = inlined_call_operand.vmem [shape: f32[16,1], index: 0, kind: input, shape index: {}]   ;;  %s857_s1 = inlined_call_operand.vmem [shape: f32[1,16], index: 1, kind: input, shape index: {}]   ;;  %s858_s2 = inlined_call_operand.hbm [shape: f32[16,32], index: 2, kind: output, shape index: {}]  }
   0x1   :  { %9 = vsyncpa [#allocation3 + $0x1], 0  ;;  %s702_s9 = smov 0   ;;  %s704_s10 = smov 0  }
   0x2   :  { %s706_s11 = smov 0   ;;  %s708_s12 = smov 0  }
   0x3 LB: > { %s723_s13 = sadd.s32 4294967295, %s677_s12   ;;  %s550_s14 = sadd.s32 4294967294, %s677_s12   ;;  %s677_s12 = sphi %s708_s12, %s864_s12   ;;  %s673_s11 = sphi %s706_s11, %s863_s11   ;;  %s669_s10 = sphi %s704_s10, %s862_s10   ;;  %s665_s9 = sphi %s702_s9, %s861_s9  }
   0x4   : > { %s727_s15 = sadd.s32 1, %s677_s12   ;;  %s69_s16 = sadd.s32 1, %s673_s11 }
   0x5   : > { %s66_s17 = ssub.s32 %s677_s12, %s727_s15  ;;  %p79_p0 = scmp.ne.s32.totalorder %s673_s11, %s669_s10 }
   0x6   : > { %p67_p1 = scmp.eq.s32.totalorder %s66_s17, 0  ;;  %p80_p2 = scmp.eq.s32.totalorder %s723_s13, 1 }
   0x7   : > { %p85_p3 = scmp.ne.s32.totalorder %s669_s10, %s665_s9  ;;  %p86_p4 = scmp.eq.s32.totalorder %s550_s14, 1 }
   0x8   : > { %s738_s18 = scalar_select %p67_p1, %s673_s11, %s69_s16  }
   0x9   : > { %p740_p5 = por %p80_p2, %p79_p0  ;;  %p744_p6 = por %p86_p4, %p85_p3 }
   0xa   : > { %p553_p7 = scmp.ge.s32.totalorder %s677_s12, 1  ;;  %p114_p8 = scmp.lt.s32.totalorder %s677_s12, 3 }
   0xc   : > { %p115_p9 = pnand %p553_p7, %p114_p8 }
   0xd   : > { %p135_p10 = scmp.lt.s32.totalorder (!%p115_p9), %s723_s13, 1  ;;  %s132_s28 = sand.u32 (!%p115_p9), 1, %s669_s10  }
   0xe   : > { %118 = sbr.rel (%p115_p9) target bundleno = 356 (0x164), region = 28  ;;  %s554_s29 = sshll.u32 (!%p115_p9), %s132_s28, 3 }
   0xf   : > { %s134_s30 = scalar_lea.vmem (!%p115_p9), [#allocation2], %s554_s29  ;;  %s686_s3 = smov (!%p115_p9), 16  }
  0x10   : > { %s563_s4 = sshll.u32 (!%p115_p9), %s723_s13, 3  ;;  %s488_s8 = sshll.u32 (!%p115_p9), %s134_s30, 4  ;;  %s489_s8 = int_to_ptr.vmem [resolvable:$true] %s488_s8 }
  0x11   : > { %s486_s7 = scalar_lea.hbm (!%p115_p9), %s858_s2, %s563_s4  ;;  %s476_s16 = scalar_lea.sflag (!%p115_p9), [#allocation3], %s132_s28 }
  0x12   : > { %s490_s14 = sshll.u32 (!%p115_p9), %s486_s7, 4  ;;  %s635_s23 = scalar_lea.hbm (!%p115_p9), %s858_s2, 16  ;;  %s491_s14 = int_to_ptr.hbm [resolvable:$true] %s490_s14 }
  0x13   : > { %v679_v0 = vmov 0   ;;  %s136_s21 = scalar_select %p135_p10, %s723_s13, 1  ;;  %v614_v3 = vld [vmem:[%s857_s1] ss:$0 sm:$0xff]  ;;  %v680_v17 = vmov 683565275  }
  0x14   : > { %613 = vset.pattern.permute.xlu0 %v679_v0  ;;  %v681_v19 = vmov 2475754826   ;;  %v682_v22 = vmov 2131351028   ;;  %v683_v25 = vmov 2102212464  }
  0x15   : > { %s555_s22 = sshll.u32 %s136_s21, 3  ;;  %v684_v28 = vmov 920167782   ;;  %v685_v31 = vmov 1326507024   ;;  %s629_s17 = sshra.s32 %s491_s14, 4  ;;  %s630_s17 = int_to_ptr.hbm [resolvable:$true] %s629_s17 }
  0x16   : > { %s138_s25 = scalar_lea.vmem %s856_s0, %s555_s22  ;;  %s631_s21 = scalar_lea.hbm %s630_s17, 8 }
  0x17   : > { %v139_v1 = vld [vmem:[%s138_s25] sm:$0xff]  ;;  %p632_p11 = scmp.ne.s32.totalorder %s630_s17, %s631_s21  ;;  %p636_p0 = scmp.lt.s32.totalorder %s630_s17, %s858_s2 }
  0x18   : > { %144 = vperm.xlu0 %613, %v139_v1   ;;  %vm140_vm0 = vcmp.ne.f32.partialorder %v139_v1, 1.0  ;;  %p637_p1 = scmp.lt.s32.totalorder %s635_s23, %s631_s21 }
  0x19   : > { %v306_v2 = vsel %vm140_vm0, 1, %v679_v0  ;;  %p633_p12 = pnand %p632_p11, %p740_p5 }
  0x1a   : > { %p638_p2 = por %p637_p1, %p636_p0 }
  0x1b   : > { %p634_p13 = pneg %p633_p12 }
  0x1d   : > { %p639_p3 = pnand %p638_p2, %p634_p13 }
  0x20   : > { %308 = vperm.xlu0 %613, %v306_v2  }
  0x8a   : > { %v145_v4 = vpop.permute.xlu0 %144 }
  0x8b   : > { %v760_v5 = vmul.f32 %v614_v3, %v145_v4 }
  0x8d   : > { %v154_v6 = vand.u32 2139095040, %v760_v5  ;;  %v151_v9 = vand.u32 2147483647, %v760_v5  ;;  %vm153_vm13 = vcmp.lt.s32.totalorder %v760_v5, 0 }
  0x8f   : > { %v155_v7 = vshrl.u32 %v154_v6, 23  ;;  %v158_v11 = vand.u32 8388607, %v151_v9  ;;  %vm152_vm14 = vcmp.le.f32.partialorder %v151_v9, 0.7853982 }
  0x91   : > { %v556_v8 = vadd.s32 4294967169, %v155_v7  ;;  %v159_v15 = vor.u32 8388608, %v158_v11 }
  0x93   : > { %v161_v10 = vadd.s32 1, %v556_v8  ;;  %v777_v38 = vshll.u32 %v159_v15, 8 }
  0x95   : > { %vm162_vm1 = vcmp.gt.s32.totalorder %v161_v10, 0  ;;  %v200_v47 = vand.u32 65535, %v777_v38  ;;  %v201_v52 = vshrl.u32 %v777_v38, 16 }
  0x96   : > { %v163_v12 = vsel %vm162_vm1, %v161_v10, 0 }
  0x97   : > { %v165_v13 = vand.u32 31, %v163_v12  ;;  %v768_v16 = vshrl.u32 %v163_v12, 5 }
  0x99   : > { %v766_v14 = vsub.s32 32, %v165_v13  ;;  %v168_v18 = vshll.u32 %v680_v17, %v165_v13  ;;  %v171_v20 = vshll.u32 %v681_v19, %v165_v13  ;;  %v174_v24 = vshll.u32 %v682_v22, %v165_v13 }
  0x9a   : > { %v177_v27 = vshll.u32 %v683_v25, %v165_v13  ;;  %v180_v30 = vshll.u32 %v684_v28, %v165_v13  ;;  %vm183_vm2 = vcmp.lt.s32.totalorder %v768_v16, 1  ;;  %vm186_vm3 = vcmp.lt.s32.totalorder %v768_v16, 4 }
  0x9b   : > { %v169_v21 = vshrl.u32 %v681_v19, %v766_v14  ;;  %v172_v23 = vshrl.u32 %v682_v22, %v766_v14  ;;  %v175_v26 = vshrl.u32 %v683_v25, %v766_v14  ;;  %v178_v29 = vshrl.u32 %v684_v28, %v766_v14 }
  0x9c   : > { %v181_v32 = vshrl.u32 %v685_v31, %v766_v14  ;;  %vm185_vm4 = vcmp.lt.s32.totalorder %v768_v16, 3  ;;  %vm184_vm5 = vcmp.lt.s32.totalorder %v768_v16, 2  ;;  %v167_v11 = vshrl.u32 %v680_v17, %v766_v14 }
  0x9d   : > { %v170_v33 = vor.u32 %v169_v21, %v168_v18  ;;  %v173_v34 = vor.u32 %v172_v23, %v171_v20  ;;  %v176_v35 = vor.u32 %v175_v26, %v174_v24  ;;  %v179_v36 = vor.u32 %v178_v29, %v177_v27 }
  0x9e   : > { %v182_v37 = vor.u32 %v181_v32, %v180_v30 }
  0x9f   : > { %v191_v39 = vsel %vm183_vm2, %v170_v33, %v173_v34  ;;  %v195_v40 = vsel %vm183_vm2, %v173_v34, %v176_v35  ;;  %v192_v41 = vsel %vm186_vm3, %v179_v36, 920167782  ;;  %v188_v4 = vsel %vm186_vm3, %v176_v35, 2102212464 }
  0xa0   : > { %v196_v42 = vsel %vm186_vm3, %v182_v37, 1326507024  ;;  %v193_v43 = vsel %vm185_vm4, %v176_v35, %v192_v41  ;;  %v187_v21 = vsel %vm183_vm2, %v167_v11, %v170_v33  ;;  %v189_v22 = vsel %vm185_vm4, %v173_v34, %v188_v4 }
  0xa1   : > { %v197_v44 = vsel %vm185_vm4, %v179_v36, %v196_v42  ;;  %v194_v45 = vsel %vm184_vm5, %v191_v39, %v193_v43  ;;  %v190_v14 = vsel %vm184_vm5, %v187_v21, %v189_v22 }
  0xa2   : > { %v198_v46 = vsel %vm184_vm5, %v195_v40, %v197_v44  ;;  %v224_v50 = vand.u32 65535, %v194_v45  ;;  %v225_v51 = vshrl.u32 %v194_v45, 16  ;;  %v244_v29 = vmul.u32 %v777_v38, %v190_v14 }
  0xa3   : > { %v202_v48 = vand.u32 65535, %v198_v46  ;;  %v203_v49 = vshrl.u32 %v198_v46, 16  ;;  %vm294_vm5 = vweird.f32 %v760_v5 }
  0xa4   : > { %v227_v54 = vmul.u32 %v225_v51, %v200_v47  ;;  %v228_v56 = vmul.u32 %v224_v50, %v201_v52  ;;  %v226_v59 = vmul.u32 %v224_v50, %v200_v47  ;;  %v229_v62 = vmul.u32 %v225_v51, %v201_v52 }
  0xa5   : > { %v205_v53 = vmul.u32 %v203_v49, %v200_v47  ;;  %v206_v55 = vmul.u32 %v202_v48, %v201_v52  ;;  %v204_v57 = vmul.u32 %v202_v48, %v200_v47  ;;  %v207_v61 = vmul.u32 %v203_v49, %v201_v52 }
  0xa6   : > { %v230_v60 = vshll.u32 %v227_v54, 16  ;;  %v232_v1 = vshll.u32 %v228_v56, 16  ;;  %v231_v19 = vshrl.u32 %v227_v54, 16  ;;  %v233_v25 = vshrl.u32 %v228_v56, 16 }
  0xa7   : > { %v208_v58 = vshll.u32 %v205_v53, 16  ;;  %v210_v63 = vshll.u32 %v206_v55, 16  ;;  %v209_v15 = vshrl.u32 %v205_v53, 16  ;;  %v211_v23 = vshrl.u32 %v206_v55, 16 }
  0xa8   : > { %vm234_vm7 = vc.u32 %v226_v59, %v230_v60  ;;  %v236_v3 = vadd.s32 %v230_v60, %v226_v59 }
  0xa9   : > { %vm212_vm6 = vc.u32 %v204_v57, %v208_v58  ;;  %v214_v2 = vadd.s32 %v208_v58, %v204_v57  ;;  %v235_v7 = vsel %vm234_vm7, 1, %v679_v0 }
  0xaa   : > { %v213_v6 = vsel %vm212_vm6, 1, %v679_v0  ;;  %v237_v10 = vadd.s32 %v235_v7, %v229_v62  ;;  %vm238_vm9 = vc.u32 %v236_v3, %v232_v1  ;;  %v240_v27 = vadd.s32 %v236_v3, %v232_v1 }
  0xab   : > { %v215_v8 = vadd.s32 %v213_v6, %v207_v61  ;;  %vm216_vm8 = vc.u32 %v214_v2, %v210_v63  ;;  %v239_v13 = vsel %vm238_vm9, 1, %v679_v0  ;;  %vm312_vm6 = vcmask 130048  }
  0xac   : > { %v217_v12 = vsel %vm216_vm8, 1, %v679_v0  ;;  %v241_v20 = vadd.s32 %v239_v13, %v237_v10  ;;  %vm473_vm8 = vcmask 261248  }
  0xad   : > { %v219_v18 = vadd.s32 %v217_v12, %v215_v8 }
  0xae   : > { %v242_v26 = vadd.s32 %v241_v20, %v231_v19 }
  0xaf   : > { %v220_v24 = vadd.s32 %v219_v18, %v209_v15  ;;  %v309_v18 = vpop.permute.xlu0 %308 }
  0xb0   : > { %v243_v0 = vadd.s32 %v242_v26, %v233_v25  ;;  %vm310_vm7 = vcmp.eq.s32.totalorder %v309_v18, 1 }
  0xb1   : > { %v221_v17 = vadd.s32 %v220_v24, %v211_v23 }
  0xb2   : > { %v247_v28 = vadd.s32 1, %v243_v0 }
  0xb3   : > { %vm246_vm10 = vc.u32 %v221_v17, %v240_v27  ;;  %v245_v41 = vadd.s32 %v240_v27, %v221_v17 }
  0xb4   : > { %v248_v30 = vsel %vm246_vm10, %v247_v28, %v243_v0 }
  0xb5   : > { %v249_v31 = vadd.s32 %v248_v30, %v244_v29 }
  0xb7   : > { %v250_v32 = vadd.s32 536870912, %v249_v31 }
  0xb9   : > { %v251_v33 = vshrl.u32 %v250_v32, 30 }
  0xbb   : > { %v252_v35 = vshll.u32 %v251_v33, 30  ;;  %v275_v54 = vsub.s32 4, %v251_v33 }
  0xbd   : > { %v253_v34 = vsub.s32 %v249_v31, %v252_v35  ;;  %v276_v59 = vsel %vm153_vm13, %v275_v54, %v251_v33 }
  0xbe   : > { %v278_v62 = vsel %vm152_vm14, 0, %v276_v59 }
  0xbf   : > { %vm254_vm11 = vcmp.lt.s32.totalorder %v253_v34, 0  ;;  %v255_v36 = vsub.s32 0, %v253_v34  ;;  %v295_v4 = vadd.s32 3, %v278_v62  ;;  %v458_v10 = vand.u32 3, %v278_v62 }
  0xc1   : > { %v256_v37 = vsel %vm254_vm11, %v255_v36, %v253_v34  ;;  %v296_v11 = vand.u32 3, %v295_v4  ;;  %vm459_vm15 = vcmp.lt.s32.totalorder %v458_v10, 2  ;;  %vm460_vm0 = vcmp.eq.s32.totalorder %v458_v10, 0 }
  0xc2   : > { %v257_v39 = vclz %v256_v37  ;;  %vm463_vm4 = vcmp.eq.s32.totalorder %v458_v10, 2 }
  0xc3   : > { %vm297_vm1 = vcmp.lt.s32.totalorder %v296_v11, 2  ;;  %vm298_vm2 = vcmp.eq.s32.totalorder %v296_v11, 0  ;;  %vm301_vm3 = vcmp.eq.s32.totalorder %v296_v11, 2 }
  0xc4   : > { %v557_v40 = vadd.s32 4294967294, %v257_v39 }
  0xc6   : > { %vm558_vm12 = vcmp.lt.s32.totalorder %v557_v40, 0 }
  0xc7   : > { %v260_v16 = vsel %vm558_vm12, 0, %v557_v40 }
  0xc8   : > { %v261_v42 = vsub.s32 32, %v260_v16  ;;  %v265_v43 = vsub.s32 4294967266, %v260_v16  ;;  %v262_v44 = vshll.u32 %v253_v34, %v260_v16 }
  0xca   : > { %v263_v45 = vshrl.u32 %v245_v41, %v261_v42  ;;  %v266_v46 = vadd.s32 127, %v265_v43 }
  0xcc   : > { %v264_v38 = vor.u32 %v263_v45, %v262_v44  ;;  %v267_v47 = vshll.u32 %v266_v46, 23 }
  0xce   : > { %v268_v48 = vor.u32 4788187, %v267_v47  ;;  %v271_v50 = vcvt.s32.f32 %v264_v38 }
  0xd0   : > { %v269_v49 = vand.u32 2147483647, %v268_v48 }
  0xd2   : > { %v272_v51 = vmul.f32 %v271_v50, %v269_v49 }
  0xd4   : > { %v273_v52 = vxor.u32 2147483648, %v272_v51 }
  0xd6   : > { %v274_v53 = vsel %vm153_vm13, %v273_v52, %v272_v51 }
  0xd7   : > { %v277_v55 = vsel %vm152_vm14, %v760_v5, %v274_v53 }
  0xd8   : > { %v279_v56 = vmul.f32 %v277_v55, %v277_v55 }
  0xda   : > { %v280_v57 = vmul.f32 -0.001358992, %v279_v56  ;;  %v287_v58 = vmul.f32 -0.00019511016, %v279_v56 }
  0xdc   : > { %v281_v60 = vadd.f32 0.041655596, %v280_v57  ;;  %v288_v61 = vadd.f32 0.008332121, %v287_v58 }
  0xde   : > { %v282_v63 = vmul.f32 %v281_v60, %v279_v56  ;;  %v289_v1 = vmul.f32 %v288_v61, %v279_v56 }
  0xe0   : > { %v283_v2 = vadd.f32 -0.4999988, %v282_v63  ;;  %v290_v3 = vadd.f32 -0.16666654, %v289_v1 }
  0xe2   : > { %v284_v6 = vmul.f32 %v283_v2, %v279_v56  ;;  %v291_v9 = vmul.f32 %v290_v3, %v279_v56 }
  0xe4   : > { %v285_v7 = vadd.f32 1.0, %v284_v6  ;;  %v292_v8 = vadd.f32 1.0, %v291_v9 }
  0xe6   : > { %v293_v12 = vmul.f32 %v292_v8, %v277_v55  ;;  %v302_v13 = vxor.u32 2147483648, %v285_v7 }
  0xe8   : > { %v299_v15 = vxor.u32 2147483648, %v293_v12  ;;  %v303_v20 = vsel %vm301_vm3, %v302_v13, %v293_v12  ;;  %v465_v22 = vsel %vm463_vm4, %v302_v13, %v293_v12 }
  0xea   : > { %v300_v19 = vsel %vm298_vm2, %v285_v7, %v299_v15  ;;  %v462_v21 = vsel %vm460_vm0, %v285_v7, %v299_v15 }
  0xeb   : > { %v304_v23 = vsel %vm297_vm1, %v300_v19, %v303_v20  ;;  %v466_v24 = vsel %vm459_vm15, %v462_v21, %v465_v22 }
  0xec   : > { %v305_v25 = vsel %vm294_vm5, nan, %v304_v23  ;;  %v467_v26 = vsel %vm294_vm5, nan, %v466_v24 }
  0xed   : > { %v311_v14 = vsel %vm310_vm7, %v305_v25, 0.0  ;;  %v468_v17 = vsel %vm310_vm7, %v467_v26, 0.0 }
  0xee   : > { %313 = vst.msk [vmem:[%s134_s30] sm:$0xff] %vm312_vm6, %v311_v14  ;;  %470 = vrot.lane.b32.xlu1 %v468_v17, %s686_s3 }
 0x160   : > { %v471_v5 = vpop.permute.xlu1 %470 }
 0x161   : > { %474 = vst.msk [vmem:[%s134_s30] sm:$0xff] %vm473_vm8, %v471_v5 }
 0x162   : > { %642 = shalt.err (!%p639_p3)
}
 0x163   : > { %566 = dma.vmem_to_hbm [thread:$0]  (%p740_p5), %s489_s8, 128, %s491_s14, %s476_s16  }
 0x164 PF: > { %p572_p4 = scmp.ge.s32.totalorder %s677_s12, 2  ;;  %s502_s26 = sand.u32 1, %s665_s9  }
 0x165   : > { %s503_s27 = scalar_lea.sflag [#allocation3], %s502_s26 }
 0x166   : > { %p569_p7 = pnand %p572_p4, %p744_p6 }
 0x168   : > { %p570_p8 = pneg %p569_p7 }
 0x16a   : > { %660 = dma.done.wait (%p570_p8), %s503_s27, 128  }
 0x16b   : > { %662 = vsyncadd (%p570_p8), %s503_s27, 4294967168  ;;  %p12_p9 = scmp.ge.s32.totalorder %s727_s15, 4   ;;  %s861_s9 = smov %s669_s10 }
 0x16c   : > { %s862_s10 = smov %s673_s11  ;;  %s863_s11 = smov %s738_s18 }
 0x16d   : > { %s864_s12 = smov %s727_s15  ;;  %14 = sbr.rel (!%p12_p9) target bundleno = 3 (0x3), region = 63 }
 0x172   :  { %509 = vsyncpa [#allocation3], 1 }
 0x173   :  { %511 = vsyncpa [#allocation3 + $0x1], 1 }

</bundles_post_ra>
